<compile_context>
chip_gen: v5e
topology: v5e:2x2
jax: 0.10.0
libtpu: 0.0.40
codegen_flags: <defaults>
</compile_context>

<pallas_src>
import functools

import jax
import jax.numpy as jnp
from jax.experimental import pallas as pl
from jax.experimental.pallas import tpu as pltpu


def _round_up(x, m):
    return (x + m - 1) // m * m


# --------------------------------------------------------------------------- kernels

def _matmul_stats_kernel(p_ref, w_ref, y_ref, sum_ref, sq_ref):
    """Conv-as-matmul tile + per-channel sum / sum-of-squares accumulation (BN layers).

    Conv bias is omitted here: PyTorch uses bias=False before BatchNorm, and any bias
    is a mathematical no-op under the mean subtraction anyway."""
    y = jnp.dot(p_ref[...], w_ref[...], preferred_element_type=jnp.float32)
    y_ref[...] = y

    @pl.when(pl.program_id(0) == 0)
    def _():
        sum_ref[...] = jnp.zeros_like(sum_ref)
        sq_ref[...] = jnp.zeros_like(sq_ref)

    sum_ref[...] += jnp.sum(y, axis=0, keepdims=True)
    sq_ref[...] += jnp.sum(y * y, axis=0, keepdims=True)


def _matmul_bias_act_kernel(p_ref, w_ref, b_ref, y_ref, *, do_act, neg_slope=0.2):
    """Conv-as-matmul tile + bias (+ LeakyReLU) for non-BN layers."""
    y = jnp.dot(p_ref[...], w_ref[...], preferred_element_type=jnp.float32)
    y = y + b_ref[...]
    if do_act:
        y = jnp.where(y > 0, y, neg_slope * y)
    y_ref[...] = y


def _bn_act_kernel(y_ref, scale_ref, shift_ref, o_ref, *, do_act, neg_slope=0.2):
    """Apply precomputed BatchNorm affine (scale/shift) + LeakyReLU per tile."""
    y = y_ref[...] * scale_ref[...] + shift_ref[...]
    if do_act:
        y = jnp.where(y > 0, y, neg_slope * y)
    o_ref[...] = y


# ----------------------------------------------------------------------- layer wrapper

def _im2col_nhwc(x, k, stride, pad):
    """x: [N, H, W, C] -> patches [N*Ho*Wo, k*k*C] with K ordered (kh, kw, C)."""
    N, H, W, C = x.shape
    xp = jnp.pad(x, ((0, 0), (pad, pad), (pad, pad), (0, 0)))
    Ho = (H + 2 * pad - k) // stride + 1
    Wo = (W + 2 * pad - k) // stride + 1
    ih = (jnp.arange(Ho) * stride)[:, None] + jnp.arange(k)[None, :]   # [Ho, k]
    iw = (jnp.arange(Wo) * stride)[:, None] + jnp.arange(k)[None, :]   # [Wo, k]
    # advanced indices on adjacent axes (1,2) -> [N, Ho, Wo, k, k, C]
    patches = xp[:, ih[:, None, :, None], iw[None, :, None, :], :]
    return patches.reshape(N * Ho * Wo, k * k * C), Ho, Wo


def conv_block(x, weight, bias, gamma, beta, *, stride, do_bn, do_act,
               k=4, pad=1, tm=256, eps=1e-5):
    """One Conv2d(k=4,p=1) [+ BatchNorm2d(batch stats)] [+ LeakyReLU(0.2)] block.

    x: NHWC [N, H, W, Cin] float32; weight: PyTorch layout [Cout, Cin, k, k].
    Returns NHWC [N, Ho, Wo, Cout] float32.
    """
    N = x.shape[0]
    Cout = weight.shape[0]

    patches, Ho, Wo = _im2col_nhwc(x, k, stride, pad)
    M, K = patches.shape

    # Lane/sublane-aligned padded sizes (full MXU rows, lane-dense output stores).
    Kp = _round_up(K, 128)
    Cp = _round_up(Cout, 128)
    TM = min(tm, _round_up(M, 8))       # modest tile -> fits v7x's smaller VMEM too
    Mp = _round_up(M, TM)
    n_tiles = Mp // TM

    # bf16 MXU inputs (f32 accumulate inside the kernel); padded rows/cols are zero.
    patches_p = jnp.pad(patches, ((0, Mp - M), (0, Kp - K))).astype(jnp.bfloat16)
    # [Cout, Cin, kh, kw] -> [kh, kw, Cin, Cout] to match the im2col K order.
    w_mat = weight.transpose(2, 3, 1, 0).reshape(K, Cout)
    w_mat = jnp.pad(w_mat, ((0, Kp - K), (0, Cp - Cout))).astype(jnp.bfloat16)

    p_spec = pl.BlockSpec((TM, Kp), lambda i: (i, 0))
    w_spec = pl.BlockSpec((Kp, Cp), lambda i: (0, 0))      # resident across the grid
    row_spec = pl.BlockSpec((1, Cp), lambda i: (0, 0))
    y_spec = pl.BlockSpec((TM, Cp), lambda i: (i, 0))

    cost = pl.CostEstimate(
        flops=2 * Mp * Kp * Cp,
        transcendentals=0,
        bytes_accessed=patches_p.size * 2 + w_mat.size * 2 + Mp * Cp * 4,
    )

    if do_bn:
        # Pass A: matmul + grid-carried per-channel sum / sum-of-squares.
        y, ch_sum, ch_sq = pl.pallas_call(
            _matmul_stats_kernel,
            grid=(n_tiles,),
            in_specs=[p_spec, w_spec],
            out_specs=[y_spec, row_spec, row_spec],
            out_shape=[
                jax.ShapeDtypeStruct((Mp, Cp), jnp.float32),
                jax.ShapeDtypeStruct((1, Cp), jnp.float32),
                jax.ShapeDtypeStruct((1, Cp), jnp.float32),
            ],
            compiler_params=pltpu.CompilerParams(
                dimension_semantics=("arbitrary",),   # stats carried across M tiles
                vmem_limit_bytes=32 * 1024 * 1024),
            cost_estimate=cost,
        )(patches_p, w_mat)

        # Finalize batch statistics over the true M = N*Ho*Wo rows (padded rows are
        # exactly zero and contribute nothing). E[x^2]-E[x]^2 in f32, clamped >= 0.
        mean = ch_sum[0] / M
        var = jnp.maximum(ch_sq[0] / M - mean * mean, 0.0)
        gamma_p = jnp.pad(gamma.astype(jnp.float32), (0, Cp - Cout), constant_values=1.0)
        beta_p = jnp.pad(beta.astype(jnp.float32), (0, Cp - Cout))
        scale = (gamma_p * jax.lax.rsqrt(var + eps)).reshape(1, Cp)
        shift = (beta_p - mean * scale[0]).reshape(1, Cp)

        # Pass B: normalize + LeakyReLU, tiled over M ("parallel" -> megacore-shardable).
        y = pl.pallas_call(
            functools.partial(_bn_act_kernel, do_act=do_act),
            grid=(n_tiles,),
            in_specs=[y_spec, row_spec, row_spec],
            out_specs=y_spec,
            out_shape=jax.ShapeDtypeStruct((Mp, Cp), jnp.float32),
            compiler_params=pltpu.CompilerParams(
                dimension_semantics=("parallel",),
                vmem_limit_bytes=32 * 1024 * 1024),
        )(y, scale, shift)
    else:
        b_row = jnp.pad(bias.astype(jnp.float32), (0, Cp - Cout)).reshape(1, Cp)
        y = pl.pallas_call(
            functools.partial(_matmul_bias_act_kernel, do_act=do_act),
            grid=(n_tiles,),
            in_specs=[p_spec, w_spec, row_spec],
            out_specs=y_spec,
            out_shape=jax.ShapeDtypeStruct((Mp, Cp), jnp.float32),
            compiler_params=pltpu.CompilerParams(
                dimension_semantics=("parallel",),
                vmem_limit_bytes=32 * 1024 * 1024),
            cost_estimate=cost,
        )(patches_p, w_mat, b_row)

    # [Mp, Cp] -> valid [M, Cout] -> NHWC
    return y[:M, :Cout].reshape(N, Ho, Wo, Cout)


# ---------------------------------------------------------------------------- model

def init_params(key, input_nc, ndf=64, n_layers=3):
    """Deterministic synthetic parameters matching NLayerDiscriminator's layer shapes.
    norm_layer = BatchNorm2d => use_bias = False for the inner convs."""
    def conv_p(k, cin, cout, use_bias):
        kw_, kb_ = jax.random.split(k)
        w = jax.random.normal(kw_, (cout, cin, 4, 4), jnp.float32) * 0.02
        b = (jax.random.normal(kb_, (cout,), jnp.float32) * 0.02
             if use_bias else jnp.zeros((cout,), jnp.float32))
        return w, b

    keys = jax.random.split(key, n_layers + 2)
    params = []

    # Conv(input_nc, ndf, s=2, bias=True) + LeakyReLU
    w, b = conv_p(keys[0], input_nc, ndf, True)
    params.append(dict(w=w, b=b, g=jnp.ones((ndf,)), beta=jnp.zeros((ndf,)),
                       stride=2, do_bn=False, do_act=True))

    nf = 1
    for i in range(1, n_layers):
        nf_prev, nf = nf, min(nf * 2, 8)
        cin, cout = ndf * nf_prev, ndf * nf
        w, b = conv_p(keys[i], cin, cout, False)
        params.append(dict(w=w, b=b, g=jnp.ones((cout,)), beta=jnp.zeros((cout,)),
                           stride=2, do_bn=True, do_act=True))

    nf_prev, nf = nf, min(nf * 2, 8)
    cin, cout = ndf * nf_prev, ndf * nf
    w, b = conv_p(keys[n_layers], cin, cout, False)
    params.append(dict(w=w, b=b, g=jnp.ones((cout,)), beta=jnp.zeros((cout,)),
                       stride=1, do_bn=True, do_act=True))

    # Final Conv(ndf*nf, 1, s=1, bias=True), no norm, no activation
    w, b = conv_p(keys[n_layers + 1], cout, 1, True)
    params.append(dict(w=w, b=b, g=jnp.ones((1,)), beta=jnp.zeros((1,)),
                       stride=1, do_bn=False, do_act=False))
    return params


def nlayer_discriminator(x_nchw, params):
    x = x_nchw.transpose(0, 2, 3, 1)          # NCHW -> NHWC once at the boundary
    for p in params:
        x = conv_block(x, p["w"], p["b"], p["g"], p["beta"],
                       stride=p["stride"], do_bn=p["do_bn"], do_act=p["do_act"])
    return x.transpose(0, 3, 1, 2)            # back to NCHW


if __name__ == "__main__":
    key = jax.random.PRNGKey(0)
    kx, kp = jax.random.split(key)

    # Small shapes: batch=2, input_nc=4, spatial=32 (so the 3 stride-2 + 2 stride-1
    # k=4 convs keep a valid spatial extent), ndf=8, n_layers=3.
    N, C, H, W = 2, 4, 32, 32
    ndf, n_layers = 8, 3

    x = jax.random.normal(kx, (N, C, H, W), jnp.float32)
    params = init_params(kp, input_nc=C, ndf=ndf, n_layers=n_layers)

    out = nlayer_discriminator(x, params)
    jax.block_until_ready(out)
    assert out.shape == (N, 1, 2, 2), out.shape
    print("KERNEL_OK")
</pallas_src>

<mosaic_0001>
module attributes {stable_mosaic.version = 11 : i64} {
  func.func @_matmul_bias_act_kernel(%arg0: i32, %arg1: memref<256x128xbf16, #tpu.memory_space<vmem>>, %arg2: memref<128x128xbf16, #tpu.memory_space<vmem>>, %arg3: memref<1x128xf32, #tpu.memory_space<vmem>>, %arg4: memref<256x128xf32, #tpu.memory_space<vmem>>) attributes {dimension_semantics = [#tpu.dimension_semantics<parallel>], iteration_bounds = array<i64: 2>, scalar_prefetch = 0 : i64, scratch_operands = 0 : i64, tpu.core_type = #tpu.core_type<tc>, window_params = [{transform_indices = @transform_0, window_bounds = array<i64: 256, 128>}, {pipeline_mode = #tpu.pipeline_mode<synchronous>, transform_indices = @transform_1, window_bounds = array<i64: 128, 128>}, {pipeline_mode = #tpu.pipeline_mode<synchronous>, transform_indices = @transform_2, window_bounds = array<i64: 1, 128>}, {transform_indices = @transform_3, window_bounds = array<i64: 256, 128>}]} {
    %c0 = arith.constant 0 : index
    %c0_0 = arith.constant 0 : index
    %0 = vector.load %arg1[%c0, %c0_0] : memref<256x128xbf16, #tpu.memory_space<vmem>>, vector<256x128xbf16>
    %c0_1 = arith.constant 0 : index
    %c0_2 = arith.constant 0 : index
    %1 = vector.load %arg2[%c0_1, %c0_2] : memref<128x128xbf16, #tpu.memory_space<vmem>>, vector<128x128xbf16>
    %cst = arith.constant dense<0.000000e+00> : vector<256x128xf32>
    %2 = tpu.matmul %0, %1, %cst {dimension_numbers = #tpu.dot_dimension_numbers<[1], [0], [0], [1], [0, 0, 1, 1], [], []>} : vector<256x128xbf16>, vector<128x128xbf16>, vector<256x128xf32> -> vector<256x128xf32>
    %c0_3 = arith.constant 0 : index
    %c0_4 = arith.constant 0 : index
    %3 = vector.load %arg3[%c0_3, %c0_4] : memref<1x128xf32, #tpu.memory_space<vmem>>, vector<1x128xf32>
    %4 = vector.broadcast %3 : vector<1x128xf32> to vector<256x128xf32>
    %5 = arith.addf %2, %4 : vector<256x128xf32>
    %cst_5 = arith.constant 0.000000e+00 : f32
    %6 = vector.broadcast %cst_5 : f32 to vector<256x128xf32>
    %7 = arith.cmpf ogt, %5, %6 : vector<256x128xf32>
    %cst_6 = arith.constant 2.000000e-01 : f32
    %8 = vector.broadcast %cst_6 : f32 to vector<256x128xf32>
    %9 = arith.mulf %8, %5 : vector<256x128xf32>
    %10 = arith.select %7, %5, %9 : vector<256x128xi1>, vector<256x128xf32>
    %c0_7 = arith.constant 0 : index
    %c0_8 = arith.constant 0 : index
    %11 = vector.load %arg4[%c0_7, %c0_8] : memref<256x128xf32, #tpu.memory_space<vmem>>, vector<256x128xf32>
    tpu.vector_store %arg4[%c0_7, %c0_8], %10 {strides = array<i32>} : memref<256x128xf32, #tpu.memory_space<vmem>>, vector<256x128xf32>,
    return
  }
  func.func @transform_0(%arg0: i32) -> (i32, i32) {
    %c0_i32 = arith.constant 0 : i32
    %c0_i32_0 = arith.constant 0 : i32
    return %arg0, %c0_i32 : i32, i32
  }
  func.func @transform_1(%arg0: i32) -> (i32, i32) {
    %c0_i32 = arith.constant 0 : i32
    %c0_i32_0 = arith.constant 0 : i32
    %c0_i32_1 = arith.constant 0 : i32
    return %c0_i32, %c0_i32_0 : i32, i32
  }
  func.func @transform_2(%arg0: i32) -> (i32, i32) {
    %c0_i32 = arith.constant 0 : i32
    %c0_i32_0 = arith.constant 0 : i32
    %c0_i32_1 = arith.constant 0 : i32
    return %c0_i32, %c0_i32_0 : i32, i32
  }
  func.func @transform_3(%arg0: i32) -> (i32, i32) {
    %c0_i32 = arith.constant 0 : i32
    %c0_i32_0 = arith.constant 0 : i32
    return %arg0, %c0_i32 : i32, i32
  }
}

</mosaic_0001>

<bundles_post_ra>
// kernel: tpu_custom_call.1
= control target key start
LH: loop header
LB: loop body
LE: loop exit
PB: predicated region body
PF: predicated region fallthrough
CT: control target
= control target key end

     0   :  { %8 = vsyncpa [#allocation3], 0  ;;  %s1338_s0 = inlined_call_operand.hbm [shape: bf16[512,128], index: 0, kind: input, shape index: {}]   ;;  %s1339_s1 = inlined_call_operand.hbm [shape: bf16[128,128], index: 1, kind: input, shape index: {}]   ;;  %s1340_s2 = inlined_call_operand.vmem [shape: f32[1,128], index: 2, kind: input, shape index: {}]   ;;  %s1341_s3 = inlined_call_operand.hbm [shape: f32[512,128], index: 3, kind: output, shape index: {}]  }
   0x1   :  { %10 = vsyncpa [#allocation3 + $0x1], 0 }
   0x2   :  { %11 = vsyncpa [#allocation6], 0 }
   0x3   :  { %12 = vsyncpa [#allocation4], 0 }
   0x4   :  { %14 = vsyncpa [#allocation4 + $0x1], 0  ;;  %s1103_s12 = smov 0   ;;  %s1105_s13 = smov 0  }
   0x5   :  { %s1107_s14 = smov 0   ;;  %s1109_s15 = smov 0  }
   0x6 LB: > { %s1124_s16 = sadd.s32 4294967295, %s1076_s15   ;;  %s722_s17 = sadd.s32 4294967294, %s1076_s15   ;;  %s1076_s15 = sphi %s1109_s15, %s1351_s15   ;;  %s1072_s14 = sphi %s1107_s14, %s1350_s14   ;;  %s1068_s13 = sphi %s1105_s13, %s1349_s13   ;;  %s1064_s12 = sphi %s1103_s12, %s1348_s12  }
   0x7   : > { %p40_p0 = scmp.ne.s32.totalorder %s1068_s13, %s1064_s12  ;;  %p41_p1 = scmp.eq.s32.totalorder %s1124_s16, 0 }
   0x8   : > { %p106_p2 = scmp.eq.s32.totalorder %s1124_s16, 1  ;;  %p112_p3 = scmp.eq.s32.totalorder %s722_s17, 1 }
   0x9   : > { %p1133_p4 = por %p41_p1, %p40_p0  ;;  %p723_p5 = scmp.ge.s32.totalorder %s1076_s15, 1 }
   0xa   : > { %p1138_p6 = por %p112_p3, %p40_p0  ;;  %p119_p7 = scmp.lt.s32.totalorder %s1076_s15, 3 }
   0xb   : > { %s130_s22 = sshll.u32 %s1339_s1, 4  ;;  %s1078_s24 = smov [#allocation5]   ;;  %s131_s22 = int_to_ptr.hbm [resolvable:$true] %s130_s22 }
   0xc   : > { %p1146_p8 = pnand %p723_p5, %p119_p7  ;;  %s132_s25 = sshll.u32 %s1078_s24, 4  ;;  %s133_s25 = int_to_ptr.vmem [resolvable:$true] %s132_s25 }
   0xd   : > { %s1156_s26 = sadd.s32 1, %s1076_s15   ;;  %s1079_s27 = smov 64  }
   0xe   : > { %p892_p9 = pneg %p1146_p8  ;;  %s1080_s28 = smov 4  }
   0xf   : > { %s24_s29 = ssub.s32 %s1076_s15, %s1156_s26  ;;  %s27_s30 = sadd.s32 1, %s1072_s14 }
  0x10   : > { %p893_p10 = pnand %p892_p9, %p41_p1  ;;  %p25_p12 = scmp.eq.s32.totalorder %s24_s29, 0 }
  0x11   : > { %p34_p13 = scmp.ne.s32.totalorder %s1072_s14, %s1068_s13  ;;  %p35_p0 = scmp.eq.s32.totalorder %s1076_s15, 0 }
  0x12   : > { %895 = dma.hbm_to_vmem [thread:$0]  (!%p893_p10), %s131_s22, 1024, %s133_s25, [#allocation6], %s1079_s27, %s1079_s27, %s1080_s28  }
  0x13   : > { %s1168_s4 = scalar_select %p25_p12, %s1072_s14, %s27_s30  }
  0x14   : > { %p1172_p3 = por %p106_p2, %p34_p13  ;;  %p905_p5 = scmp.lt.s32.totalorder %s1076_s15, 2 }
  0x15   : > { %s149_s6 = sand.u32 1, %s1072_s14   ;;  %s834_s7 = sshll.u32 %s1076_s15, 7 }
  0x16   : > { %p36_p7 = por %p35_p0, %p34_p13  ;;  %s726_s8 = sshll.u32 %s149_s6, 7 }
  0x17   : > { %s158_s11 = scalar_lea.hbm %s1338_s0, %s834_s7  ;;  %s153_s20 = scalar_lea.vmem [#allocation2], %s726_s8 }
  0x18   : > { %s159_s17 = sshll.u32 %s158_s11, 4  ;;  %s161_s21 = sshll.u32 %s153_s20, 4  ;;  %s160_s17 = int_to_ptr.hbm [resolvable:$true] %s159_s17  ;;  %s162_s21 = int_to_ptr.vmem [resolvable:$true] %s161_s21 }
  0x19   : > { %p1182_p9 = pnand %p905_p5, %p36_p7  ;;  %s150_s24 = scalar_lea.sflag [#allocation3], %s149_s6 }
  0x1a   : > { %s976_s25 = sshra.s32 %s160_s17, 4  ;;  %s983_s8 = scalar_lea.hbm %s1338_s0, 256  ;;  %s977_s25 = int_to_ptr.hbm [resolvable:$true] %s976_s25 }
  0x1b   : > { %s978_s29 = scalar_lea.hbm %s977_s25, 128  ;;  %p980_p10 = pneg %p1182_p9 }
  0x1c   : > { %p979_p2 = scmp.ne.s32.totalorder %s977_s25, %s978_s29  ;;  %p984_p0 = scmp.lt.s32.totalorder %s977_s25, %s1338_s0 }
  0x1d   : > { %p985_p5 = scmp.lt.s32.totalorder %s983_s8, %s978_s29 }
  0x1e   : > { %p981_p12 = pnand %p980_p10, %p979_p2 }
  0x1f   : > { %p986_p7 = por %p985_p5, %p984_p0 }
  0x20   : > { %p982_p13 = pneg %p981_p12 }
  0x22   : > { %p987_p11 = pnand %p986_p7, %p982_p13 }
  0x24   : > { %990 = shalt.err (!%p987_p11)
}
  0x25   : > { %899 = dma.hbm_to_vmem [thread:$0]  (!%p1182_p9), %s160_s17, 2048, %s162_s21, %s150_s24, %s1079_s27, %s1079_s27, %s1080_s28  }
  0x26   : > { %173 = sbr.rel (%p1146_p8) target bundleno = 277 (0x115), region = 32  ;;  %s1202_s6 = sand.u32 (!%p1146_p8), 1, %s1068_s13  }
  0x27   : > { %s730_s11 = sshll.u32 (!%p1146_p8), %s1202_s6, 7  ;;  %s176_s20 = scalar_lea.sflag (!%p1146_p8), [#allocation3], %s1202_s6 }
  0x28   : > { %s1206_s25 = scalar_lea.vmem (!%p1146_p8), [#allocation2], %s730_s11 }
  0x2b   : > { %1051 = dma.done.wait (%p1133_p4), %s176_s20, 2048  }
  0x2c   : > { %1053 = vsyncadd (%p1133_p4), %s176_s20, 4294965248 }
  0x2d   : > { %1055 = dma.done.wait (%p41_p1), [#allocation6], 1024  }
  0x2e   : > { %1057 = vsyncadd (%p41_p1), [#allocation6], 4294966272  ;;  %v858_v0 = vld [vmem:[#allocation5 + $0x38] sm:$0xff]  ;;  %v857_v1 = vld [vmem:[#allocation5 + $0x30] sm:$0xff]  ;;  %s732_s27 = sshll.u32 %s1202_s6, 8  ;;  %s859_s17 = sshll.u32 %s1124_s16, 8 }
  0x2f   : > { %406 = vmatpush.bf16.msra.mxu0 %v858_v0  ;;  %860 = vmatpush.bf16.msra.mxu1 %v858_v0  ;;  %v856_v2 = vld [vmem:[#allocation5 + $0x28] sm:$0xff]  ;;  %v855_v3 = vld [vmem:[#allocation5 + $0x20] sm:$0xff]  ;;  %v854_v4 = vld [vmem:[#allocation5 + $0x18] sm:$0xff]  ;;  %s1240_s28 = scalar_lea.vmem [#allocation7], %s732_s27  ;;  %s635_s16 = scalar_lea.hbm %s1341_s3, %s859_s17 }
  0x30   : > { %861 = vmatpush.bf16.msra.mxu2 %v858_v0  ;;  %862 = vmatpush.bf16.msra.mxu3 %v858_v0  ;;  %v853_v5 = vld [vmem:[#allocation5 + $0x10] sm:$0xff]  ;;  %v852_v6 = vld [vmem:[#allocation5 + $0x8] sm:$0xff]  ;;  %v851_v7 = vld [vmem:[#allocation5] sm:$0xff]  ;;  %s636_s24 = sshll.u32 %s1240_s28, 4  ;;  %s638_s29 = sshll.u32 %s635_s16, 4  ;;  %s637_s24 = int_to_ptr.vmem [resolvable:$true] %s636_s24  ;;  %s639_s29 = int_to_ptr.hbm [resolvable:$true] %s638_s29 }
  0x31   : > { %v835_v8 = vld [vmem:[%s1206_s25] sm:$0xff]  ;;  %v836_v12 = vld [vmem:[%s1206_s25 + $0x8] sm:$0xff]  ;;  %v837_v16 = vld [vmem:[%s1206_s25 + $0x10] sm:$0xff]  ;;  %s624_s30 = scalar_lea.sflag [#allocation4], %s1202_s6  ;;  %s1020_s7 = sshra.s32 %s639_s29, 4  ;;  %s1021_s7 = int_to_ptr.hbm [resolvable:$true] %s1020_s7 }
  0x32   : > { %v839_v9 = vld [vmem:[%s1206_s25 + $0x20] sm:$0xff]  ;;  %v840_v13 = vld [vmem:[%s1206_s25 + $0x28] sm:$0xff]  ;;  %v841_v17 = vld [vmem:[%s1206_s25 + $0x30] sm:$0xff]  ;;  %s1022_s8 = scalar_lea.hbm %s1021_s7, 256  ;;  %s1026_s11 = scalar_lea.hbm %s1341_s3, 512 }
  0x33   : > { %407 = vmatpush.bf16.msra.mxu0 %v857_v1  ;;  %863 = vmatpush.bf16.msra.mxu1 %v857_v1  ;;  %v843_v10 = vld [vmem:[%s1206_s25 + $0x40] sm:$0xff]  ;;  %v844_v14 = vld [vmem:[%s1206_s25 + $0x48] sm:$0xff]  ;;  %v845_v18 = vld [vmem:[%s1206_s25 + $0x50] sm:$0xff]  ;;  %p1023_p1 = scmp.ne.s32.totalorder %s1021_s7, %s1022_s8  ;;  %p1027_p11 = scmp.lt.s32.totalorder %s1021_s7, %s1341_s3 }
  0x34   : > { %864 = vmatpush.bf16.msra.mxu2 %v857_v1  ;;  %865 = vmatpush.bf16.msra.mxu3 %v857_v1  ;;  %v847_v11 = vld [vmem:[%s1206_s25 + $0x60] sm:$0xff]  ;;  %v848_v15 = vld [vmem:[%s1206_s25 + $0x68] sm:$0xff]  ;;  %v849_v19 = vld [vmem:[%s1206_s25 + $0x70] sm:$0xff]  ;;  %p1028_p9 = scmp.lt.s32.totalorder %s1026_s11, %s1022_s8 }
  0x35   : > { %v838_v20 = vld [vmem:[%s1206_s25 + $0x18] sm:$0xff]  ;;  %v1235_v24 = vld [vmem:[%s1340_s2] ss:$0 sm:$0xff]  ;;  %p1024_p4 = pnand %p1023_p1, %p1172_p3 }
  0x36   : > { %v842_v21 = vld [vmem:[%s1206_s25 + $0x38] sm:$0xff]  ;;  %p1029_p2 = por %p1028_p9, %p1027_p11 }
  0x37   : > { %408 = vmatpush.bf16.msra.mxu0 %v856_v2  ;;  %866 = vmatpush.bf16.msra.mxu1 %v856_v2  ;;  %v846_v22 = vld [vmem:[%s1206_s25 + $0x58] sm:$0xff]  ;;  %p1025_p8 = pneg %p1024_p4 }
  0x38   : > { %867 = vmatpush.bf16.msra.mxu2 %v856_v2  ;;  %868 = vmatpush.bf16.msra.mxu3 %v856_v2  ;;  %v850_v23 = vld [vmem:[%s1206_s25 + $0x78] sm:$0xff] }
  0x39   : > { %p1030_p10 = pnand %p1029_p2, %p1025_p8 }
  0x3b   : > { %409 = vmatpush.bf16.msra.mxu0 %v855_v3  ;;  %869 = vmatpush.bf16.msra.mxu1 %v855_v3 }
  0x3c   : > { %870 = vmatpush.bf16.msra.mxu2 %v855_v3  ;;  %871 = vmatpush.bf16.msra.mxu3 %v855_v3 }
  0x3f   : > { %410 = vmatpush.bf16.msra.mxu0 %v854_v4  ;;  %872 = vmatpush.bf16.msra.mxu1 %v854_v4 }
  0x40   : > { %873 = vmatpush.bf16.msra.mxu2 %v854_v4  ;;  %874 = vmatpush.bf16.msra.mxu3 %v854_v4 }
  0x43   : > { %411 = vmatpush.bf16.msra.mxu0 %v853_v5  ;;  %875 = vmatpush.bf16.msra.mxu1 %v853_v5 }
  0x44   : > { %876 = vmatpush.bf16.msra.mxu2 %v853_v5  ;;  %877 = vmatpush.bf16.msra.mxu3 %v853_v5 }
  0x47   : > { %412 = vmatpush.bf16.msra.mxu0 %v852_v6  ;;  %878 = vmatpush.bf16.msra.mxu1 %v852_v6 }
  0x48   : > { %879 = vmatpush.bf16.msra.mxu2 %v852_v6  ;;  %880 = vmatpush.bf16.msra.mxu3 %v852_v6 }
  0x4b   : > { %413 = vmatpush.bf16.msra.mxu0 %v851_v7  ;;  %881 = vmatpush.bf16.msra.mxu1 %v851_v7 }
  0x4c   : > { %882 = vmatpush.bf16.msra.mxu2 %v851_v7  ;;  %883 = vmatpush.bf16.msra.mxu3 %v851_v7 }
  0x4e   : > { %414 = vmatmul.bf16.vlgmr.msra.gmra.mxu0 %v835_v8  ;;  %434 = vmatmul.bf16.vlgmr.msra.gmra.mxu1 %v839_v9 }
  0x4f   : > { %454 = vmatmul.bf16.vlgmr.msra.gmra.mxu2 %v843_v10  ;;  %474 = vmatmul.bf16.vlgmr.msra.gmra.mxu3 %v847_v11 }
  0x5e   : > { %419 = vmatmul.bf16.gmra.mxu0 %v836_v12  ;;  %439 = vmatmul.bf16.gmra.mxu1 %v840_v13 }
  0x5f   : > { %459 = vmatmul.bf16.gmra.mxu2 %v844_v14  ;;  %479 = vmatmul.bf16.gmra.mxu3 %v848_v15 }
  0x6e   : > { %424 = vmatmul.bf16.gmra.mxu0 %v837_v16  ;;  %444 = vmatmul.bf16.gmra.mxu1 %v841_v17 }
  0x6f   : > { %464 = vmatmul.bf16.gmra.mxu2 %v845_v18  ;;  %484 = vmatmul.bf16.gmra.mxu3 %v849_v19 }
  0x7e   : > { %429 = vmatmul.bf16.gmra.mxu0 %v838_v20  ;;  %449 = vmatmul.bf16.gmra.mxu1 %v842_v21 }
  0x7f   : > { %469 = vmatmul.bf16.gmra.mxu2 %v846_v22  ;;  %489 = vmatmul.bf16.gmra.mxu3 %v850_v23 }
  0xcb   : > { %v415_v25 = vpop.f32.mrf.mxu0  ;;  %v435_v26 = vpop.f32.mrf.mxu1 }
  0xcc   : > { %v416_v27 = vadd.f32 %v1235_v24, %v415_v25  ;;  %v436_v28 = vadd.f32 %v1235_v24, %v435_v26 }
  0xce   : > { %vm495_vm0 = vcmp.gt.f32.partialorder %v416_v27, 0.0  ;;  %v527_v29 = vmul.f32 0.2, %v416_v27  ;;  %vm503_vm1 = vcmp.gt.f32.partialorder %v436_v28, 0.0  ;;  %v535_v30 = vmul.f32 0.2, %v436_v28 }
  0xd0   : > { %v559_v31 = vsel %vm495_vm0, %v416_v27, %v527_v29  ;;  %v567_v32 = vsel %vm503_vm1, %v436_v28, %v535_v30 }
  0xd1   : > { %591 = vst [vmem:[%s1240_s28] sm:$0xff] %v559_v31 }
  0xd2   : > { %599 = vst [vmem:[%s1240_s28 + $0x40] sm:$0xff] %v567_v32  ;;  %v455_v33 = vpop.f32.mrf.mxu2  ;;  %v475_v34 = vpop.f32.mrf.mxu3 }
  0xd3   : > { %v456_v35 = vadd.f32 %v1235_v24, %v455_v33  ;;  %v476_v36 = vadd.f32 %v1235_v24, %v475_v34  ;;  %v417_v37 = vpop.f32.mrf.mxu0  ;;  %v437_v38 = vpop.f32.mrf.mxu1 }
  0xd4   : > { %v418_v39 = vadd.f32 %v1235_v24, %v417_v37  ;;  %v438_v40 = vadd.f32 %v1235_v24, %v437_v38 }
  0xd5   : > { %vm511_vm2 = vcmp.gt.f32.partialorder %v456_v35, 0.0  ;;  %v543_v41 = vmul.f32 0.2, %v456_v35  ;;  %vm519_vm3 = vcmp.gt.f32.partialorder %v476_v36, 0.0  ;;  %v551_v42 = vmul.f32 0.2, %v476_v36 }
  0xd6   : > { %vm496_vm4 = vcmp.gt.f32.partialorder %v418_v39, 0.0  ;;  %v528_v43 = vmul.f32 0.2, %v418_v39  ;;  %vm504_vm5 = vcmp.gt.f32.partialorder %v438_v40, 0.0  ;;  %v536_v44 = vmul.f32 0.2, %v438_v40 }
  0xd7   : > { %v575_v45 = vsel %vm511_vm2, %v456_v35, %v543_v41  ;;  %v583_v46 = vsel %vm519_vm3, %v476_v36, %v551_v42 }
  0xd8   : > { %607 = vst [vmem:[%s1240_s28 + $0x80] sm:$0xff] %v575_v45  ;;  %v560_v47 = vsel %vm496_vm4, %v418_v39, %v528_v43  ;;  %v568_v48 = vsel %vm504_vm5, %v438_v40, %v536_v44 }
  0xd9   : > { %615 = vst [vmem:[%s1240_s28 + $0xc0] sm:$0xff] %v583_v46 }
  0xda   : > { %592 = vst [vmem:[%s1240_s28 + $0x8] sm:$0xff] %v560_v47  ;;  %v457_v49 = vpop.f32.mrf.mxu2  ;;  %v477_v50 = vpop.f32.mrf.mxu3 }
  0xdb   : > { %600 = vst [vmem:[%s1240_s28 + $0x48] sm:$0xff] %v568_v48  ;;  %v458_v51 = vadd.f32 %v1235_v24, %v457_v49  ;;  %v478_v52 = vadd.f32 %v1235_v24, %v477_v50  ;;  %v420_v53 = vpop.f32.mrf.mxu0  ;;  %v440_v54 = vpop.f32.mrf.mxu1 }
  0xdc   : > { %v421_v55 = vadd.f32 %v1235_v24, %v420_v53  ;;  %v441_v56 = vadd.f32 %v1235_v24, %v440_v54 }
  0xdd   : > { %vm512_vm6 = vcmp.gt.f32.partialorder %v458_v51, 0.0  ;;  %v544_v57 = vmul.f32 0.2, %v458_v51  ;;  %vm520_vm7 = vcmp.gt.f32.partialorder %v478_v52, 0.0  ;;  %v552_v58 = vmul.f32 0.2, %v478_v52 }
  0xde   : > { %vm497_vm8 = vcmp.gt.f32.partialorder %v421_v55, 0.0  ;;  %v529_v59 = vmul.f32 0.2, %v421_v55  ;;  %vm505_vm9 = vcmp.gt.f32.partialorder %v441_v56, 0.0  ;;  %v537_v60 = vmul.f32 0.2, %v441_v56 }
  0xdf   : > { %v576_v61 = vsel %vm512_vm6, %v458_v51, %v544_v57  ;;  %v584_v62 = vsel %vm520_vm7, %v478_v52, %v552_v58 }
  0xe0   : > { %608 = vst [vmem:[%s1240_s28 + $0x88] sm:$0xff] %v576_v61  ;;  %v561_v63 = vsel %vm497_vm8, %v421_v55, %v529_v59  ;;  %v569_v0 = vsel %vm505_vm9, %v441_v56, %v537_v60 }
  0xe1   : > { %616 = vst [vmem:[%s1240_s28 + $0xc8] sm:$0xff] %v584_v62 }
  0xe2   : > { %593 = vst [vmem:[%s1240_s28 + $0x10] sm:$0xff] %v561_v63  ;;  %v460_v1 = vpop.f32.mrf.mxu2  ;;  %v480_v2 = vpop.f32.mrf.mxu3 }
  0xe3   : > { %601 = vst [vmem:[%s1240_s28 + $0x50] sm:$0xff] %v569_v0  ;;  %v461_v3 = vadd.f32 %v1235_v24, %v460_v1  ;;  %v481_v4 = vadd.f32 %v1235_v24, %v480_v2  ;;  %v422_v5 = vpop.f32.mrf.mxu0  ;;  %v442_v6 = vpop.f32.mrf.mxu1 }
  0xe4   : > { %v423_v7 = vadd.f32 %v1235_v24, %v422_v5  ;;  %v443_v8 = vadd.f32 %v1235_v24, %v442_v6 }
  0xe5   : > { %vm513_vm10 = vcmp.gt.f32.partialorder %v461_v3, 0.0  ;;  %v545_v9 = vmul.f32 0.2, %v461_v3  ;;  %vm521_vm11 = vcmp.gt.f32.partialorder %v481_v4, 0.0  ;;  %v553_v10 = vmul.f32 0.2, %v481_v4 }
  0xe6   : > { %vm498_vm12 = vcmp.gt.f32.partialorder %v423_v7, 0.0  ;;  %v530_v11 = vmul.f32 0.2, %v423_v7  ;;  %vm506_vm13 = vcmp.gt.f32.partialorder %v443_v8, 0.0  ;;  %v538_v12 = vmul.f32 0.2, %v443_v8 }
  0xe7   : > { %v577_v13 = vsel %vm513_vm10, %v461_v3, %v545_v9  ;;  %v585_v14 = vsel %vm521_vm11, %v481_v4, %v553_v10 }
  0xe8   : > { %609 = vst [vmem:[%s1240_s28 + $0x90] sm:$0xff] %v577_v13  ;;  %v562_v15 = vsel %vm498_vm12, %v423_v7, %v530_v11  ;;  %v570_v16 = vsel %vm506_vm13, %v443_v8, %v538_v12 }
  0xe9   : > { %617 = vst [vmem:[%s1240_s28 + $0xd0] sm:$0xff] %v585_v14 }
  0xea   : > { %594 = vst [vmem:[%s1240_s28 + $0x18] sm:$0xff] %v562_v15  ;;  %v462_v17 = vpop.f32.mrf.mxu2  ;;  %v482_v18 = vpop.f32.mrf.mxu3 }
  0xeb   : > { %602 = vst [vmem:[%s1240_s28 + $0x58] sm:$0xff] %v570_v16  ;;  %v463_v19 = vadd.f32 %v1235_v24, %v462_v17  ;;  %v483_v20 = vadd.f32 %v1235_v24, %v482_v18  ;;  %v425_v21 = vpop.f32.mrf.mxu0  ;;  %v445_v22 = vpop.f32.mrf.mxu1 }
  0xec   : > { %v426_v23 = vadd.f32 %v1235_v24, %v425_v21  ;;  %v446_v25 = vadd.f32 %v1235_v24, %v445_v22 }
  0xed   : > { %vm514_vm14 = vcmp.gt.f32.partialorder %v463_v19, 0.0  ;;  %v546_v26 = vmul.f32 0.2, %v463_v19  ;;  %vm522_vm15 = vcmp.gt.f32.partialorder %v483_v20, 0.0  ;;  %v554_v27 = vmul.f32 0.2, %v483_v20 }
  0xee   : > { %vm499_vm0 = vcmp.gt.f32.partialorder %v426_v23, 0.0  ;;  %v531_v28 = vmul.f32 0.2, %v426_v23  ;;  %vm507_vm1 = vcmp.gt.f32.partialorder %v446_v25, 0.0  ;;  %v539_v29 = vmul.f32 0.2, %v446_v25 }
  0xef   : > { %v578_v30 = vsel %vm514_vm14, %v463_v19, %v546_v26  ;;  %v586_v31 = vsel %vm522_vm15, %v483_v20, %v554_v27 }
  0xf0   : > { %610 = vst [vmem:[%s1240_s28 + $0x98] sm:$0xff] %v578_v30  ;;  %v563_v32 = vsel %vm499_vm0, %v426_v23, %v531_v28  ;;  %v571_v33 = vsel %vm507_vm1, %v446_v25, %v539_v29 }
  0xf1   : > { %618 = vst [vmem:[%s1240_s28 + $0xd8] sm:$0xff] %v586_v31 }
  0xf2   : > { %595 = vst [vmem:[%s1240_s28 + $0x20] sm:$0xff] %v563_v32  ;;  %v465_v34 = vpop.f32.mrf.mxu2  ;;  %v485_v35 = vpop.f32.mrf.mxu3 }
  0xf3   : > { %603 = vst [vmem:[%s1240_s28 + $0x60] sm:$0xff] %v571_v33  ;;  %v466_v36 = vadd.f32 %v1235_v24, %v465_v34  ;;  %v486_v37 = vadd.f32 %v1235_v24, %v485_v35  ;;  %v427_v38 = vpop.f32.mrf.mxu0  ;;  %v447_v39 = vpop.f32.mrf.mxu1 }
  0xf4   : > { %v428_v40 = vadd.f32 %v1235_v24, %v427_v38  ;;  %v448_v41 = vadd.f32 %v1235_v24, %v447_v39 }
  0xf5   : > { %vm515_vm2 = vcmp.gt.f32.partialorder %v466_v36, 0.0  ;;  %v547_v42 = vmul.f32 0.2, %v466_v36  ;;  %vm523_vm3 = vcmp.gt.f32.partialorder %v486_v37, 0.0  ;;  %v555_v43 = vmul.f32 0.2, %v486_v37 }
  0xf6   : > { %vm500_vm4 = vcmp.gt.f32.partialorder %v428_v40, 0.0  ;;  %v532_v44 = vmul.f32 0.2, %v428_v40  ;;  %vm508_vm5 = vcmp.gt.f32.partialorder %v448_v41, 0.0  ;;  %v540_v45 = vmul.f32 0.2, %v448_v41 }
  0xf7   : > { %v579_v46 = vsel %vm515_vm2, %v466_v36, %v547_v42  ;;  %v587_v47 = vsel %vm523_vm3, %v486_v37, %v555_v43 }
  0xf8   : > { %611 = vst [vmem:[%s1240_s28 + $0xa0] sm:$0xff] %v579_v46  ;;  %v564_v48 = vsel %vm500_vm4, %v428_v40, %v532_v44  ;;  %v572_v49 = vsel %vm508_vm5, %v448_v41, %v540_v45 }
  0xf9   : > { %619 = vst [vmem:[%s1240_s28 + $0xe0] sm:$0xff] %v587_v47 }
  0xfa   : > { %596 = vst [vmem:[%s1240_s28 + $0x28] sm:$0xff] %v564_v48  ;;  %v467_v50 = vpop.f32.mrf.mxu2  ;;  %v487_v51 = vpop.f32.mrf.mxu3 }
  0xfb   : > { %604 = vst [vmem:[%s1240_s28 + $0x68] sm:$0xff] %v572_v49  ;;  %v468_v52 = vadd.f32 %v1235_v24, %v467_v50  ;;  %v488_v53 = vadd.f32 %v1235_v24, %v487_v51  ;;  %v430_v54 = vpop.f32.mrf.mxu0  ;;  %v450_v55 = vpop.f32.mrf.mxu1 }
  0xfc   : > { %v431_v56 = vadd.f32 %v1235_v24, %v430_v54  ;;  %v451_v57 = vadd.f32 %v1235_v24, %v450_v55 }
  0xfd   : > { %vm516_vm6 = vcmp.gt.f32.partialorder %v468_v52, 0.0  ;;  %v548_v58 = vmul.f32 0.2, %v468_v52  ;;  %vm524_vm7 = vcmp.gt.f32.partialorder %v488_v53, 0.0  ;;  %v556_v59 = vmul.f32 0.2, %v488_v53 }
  0xfe   : > { %vm501_vm8 = vcmp.gt.f32.partialorder %v431_v56, 0.0  ;;  %v533_v60 = vmul.f32 0.2, %v431_v56  ;;  %vm509_vm9 = vcmp.gt.f32.partialorder %v451_v57, 0.0  ;;  %v541_v61 = vmul.f32 0.2, %v451_v57 }
  0xff   : > { %v580_v62 = vsel %vm516_vm6, %v468_v52, %v548_v58  ;;  %v588_v63 = vsel %vm524_vm7, %v488_v53, %v556_v59 }
 0x100   : > { %612 = vst [vmem:[%s1240_s28 + $0xa8] sm:$0xff] %v580_v62  ;;  %v565_v0 = vsel %vm501_vm8, %v431_v56, %v533_v60  ;;  %v573_v1 = vsel %vm509_vm9, %v451_v57, %v541_v61 }
 0x101   : > { %620 = vst [vmem:[%s1240_s28 + $0xe8] sm:$0xff] %v588_v63 }
 0x102   : > { %597 = vst [vmem:[%s1240_s28 + $0x30] sm:$0xff] %v565_v0  ;;  %v470_v2 = vpop.f32.mrf.mxu2  ;;  %v490_v3 = vpop.f32.mrf.mxu3 }
 0x103   : > { %605 = vst [vmem:[%s1240_s28 + $0x70] sm:$0xff] %v573_v1  ;;  %v471_v4 = vadd.f32 %v1235_v24, %v470_v2  ;;  %v491_v5 = vadd.f32 %v1235_v24, %v490_v3  ;;  %v432_v6 = vpop.f32.mrf.mxu0  ;;  %v452_v7 = vpop.f32.mrf.mxu1 }
 0x104   : > { %v433_v8 = vadd.f32 %v1235_v24, %v432_v6  ;;  %v453_v9 = vadd.f32 %v1235_v24, %v452_v7 }
 0x105   : > { %vm517_vm10 = vcmp.gt.f32.partialorder %v471_v4, 0.0  ;;  %v549_v10 = vmul.f32 0.2, %v471_v4  ;;  %vm525_vm11 = vcmp.gt.f32.partialorder %v491_v5, 0.0  ;;  %v557_v11 = vmul.f32 0.2, %v491_v5 }
 0x106   : > { %vm502_vm12 = vcmp.gt.f32.partialorder %v433_v8, 0.0  ;;  %v534_v12 = vmul.f32 0.2, %v433_v8  ;;  %vm510_vm13 = vcmp.gt.f32.partialorder %v453_v9, 0.0  ;;  %v542_v13 = vmul.f32 0.2, %v453_v9 }
 0x107   : > { %v581_v14 = vsel %vm517_vm10, %v471_v4, %v549_v10  ;;  %v589_v15 = vsel %vm525_vm11, %v491_v5, %v557_v11 }
 0x108   : > { %613 = vst [vmem:[%s1240_s28 + $0xb0] sm:$0xff] %v581_v14  ;;  %v566_v16 = vsel %vm502_vm12, %v433_v8, %v534_v12  ;;  %v574_v17 = vsel %vm510_vm13, %v453_v9, %v542_v13 }
 0x109   : > { %621 = vst [vmem:[%s1240_s28 + $0xf0] sm:$0xff] %v589_v15 }
 0x10a   : > { %598 = vst [vmem:[%s1240_s28 + $0x38] sm:$0xff] %v566_v16  ;;  %v472_v18 = vpop.f32.mrf.mxu2  ;;  %v492_v19 = vpop.f32.mrf.mxu3 }
 0x10b   : > { %606 = vst [vmem:[%s1240_s28 + $0x78] sm:$0xff] %v574_v17  ;;  %v473_v20 = vadd.f32 %v1235_v24, %v472_v18  ;;  %v493_v21 = vadd.f32 %v1235_v24, %v492_v19 }
 0x10d   : > { %vm518_vm14 = vcmp.gt.f32.partialorder %v473_v20, 0.0  ;;  %v550_v22 = vmul.f32 0.2, %v473_v20  ;;  %vm526_vm15 = vcmp.gt.f32.partialorder %v493_v21, 0.0  ;;  %v558_v23 = vmul.f32 0.2, %v493_v21 }
 0x10f   : > { %v582_v25 = vsel %vm518_vm14, %v473_v20, %v550_v22  ;;  %v590_v26 = vsel %vm526_vm15, %v493_v21, %v558_v23 }
 0x110   : > { %614 = vst [vmem:[%s1240_s28 + $0xb8] sm:$0xff] %v582_v25 }
 0x111   : > { %622 = vst [vmem:[%s1240_s28 + $0xf8] sm:$0xff] %v590_v26 }
 0x112   : > { %1033 = shalt.err (!%p1030_p10)
}
 0x113   : > { %s1081_s6 = smov 128   ;;  %s1082_s18 = smov 8  }
 0x114   : > { %890 = dma.vmem_to_hbm [thread:$0]  (%p1172_p3), %s637_s24, 4096, %s639_s29, %s624_s30, %s1081_s6, %s1081_s6, %s1082_s18  }
 0x115 PF: > { %s653_s23 = sand.u32 1, %s1064_s12   ;;  %p1347_p12 = scmp.ge.s32.totalorder %s1076_s15, 2 }
 0x116   : > { %s654_s27 = scalar_lea.sflag [#allocation4], %s653_s23 }
 0x117   : > { %p901_p13 = pnand %p1347_p12, %p1138_p6 }
 0x119   : > { %p902_p0 = pneg %p901_p13 }
 0x11b   : > { %1059 = dma.done.wait (%p902_p0), %s654_s27, 4096  }
 0x11c   : > { %1061 = vsyncadd (%p902_p0), %s654_s27, 4294963200  ;;  %p17_p5 = scmp.ge.s32.totalorder %s1156_s26, 4   ;;  %s1348_s12 = smov %s1068_s13 }
 0x11d   : > { %s1349_s13 = smov %s1072_s14  ;;  %s1350_s14 = smov %s1168_s4 }
 0x11e   : > { %s1351_s15 = smov %s1156_s26  ;;  %19 = sbr.rel (!%p17_p5) target bundleno = 6 (0x6), region = 81 }
 0x123   :  { %660 = vsyncpa [#allocation3], 1 }
 0x124   :  { %662 = vsyncpa [#allocation3 + $0x1], 1 }
 0x125   :  { %663 = vsyncpa [#allocation6], 1 }
 0x126   :  { %664 = vsyncpa [#allocation4], 1 }
 0x127   :  { %666 = vsyncpa [#allocation4 + $0x1], 1 }

</bundles_post_ra>
